<compile_context>
chip_gen: v7x
topology: tpu7x:2x2x1
jax: 0.10.0
libtpu: 0.0.40
codegen_flags: <defaults>
</compile_context>

<pallas_src>
import functools

import jax
import jax.numpy as jnp
from jax.experimental import pallas as pl
from jax.experimental.pallas import tpu as pltpu


def _ffwd_kernel(x_ref, w1_ref, b1_ref, w2_ref, b2_ref, o_ref, acc_ref):
    # x_ref: (tm, E), w1_ref: (E, th), b1_ref: (1, th),
    # w2_ref: (th, E), b2_ref: (1, E), o_ref: (tm, E), acc_ref: (tm, E) f32
    j = pl.program_id(1)

    @pl.when(j == 0)
    def _init():
        acc_ref[...] = jnp.zeros_like(acc_ref)

    x = x_ref[...]
    # First linear (partial over this H tile) + bias + ReLU, f32 accumulation.
    h = jnp.dot(x, w1_ref[...], preferred_element_type=jnp.float32)
    h = jnp.maximum(h + b1_ref[...], 0.0)
    # Second linear: accumulate this H tile's contribution.
    acc_ref[...] += jnp.dot(h.astype(x.dtype), w2_ref[...],
                            preferred_element_type=jnp.float32)

    @pl.when(j == pl.num_programs(1) - 1)
    def _finalize():
        o_ref[...] = (acc_ref[...] + b2_ref[...]).astype(o_ref.dtype)


def _round_up(x, m):
    return ((x + m - 1) // m) * m


@functools.partial(jax.jit, static_argnames=("block_m", "block_h"))
def feed_forward(x, w1_t, b1, w2_t, b2, *, block_m=256, block_h=512):
    """x: (B, T, E) -> (B, T, E).  w1_t: (E, H), b1: (H,), w2_t: (H, E), b2: (E,)."""
    B, T, E = x.shape
    H = w1_t.shape[1]
    M = B * T
    x2d = x.reshape(M, E)

    # Fixed token tile (multiple of 128 sublane-rows for MXU fill); clamp for
    # tiny M so toy shapes don't pad 16x, and zero-pad ragged M.
    tm = min(int(block_m), _round_up(M, 128))
    Mp = _round_up(M, tm)
    if Mp != M:
        x2d = jnp.pad(x2d, ((0, Mp - M), (0, 0)))

    # Hidden-dim tile: stream W1/W2 in (E, th)/(th, E) chunks; fall back to the
    # full H when it doesn't divide evenly (H = 4*E is a multiple of 512 for
    # realistic E).
    th = int(block_h) if (H % int(block_h) == 0) else H

    b1_2d = b1.reshape(1, H)
    b2_2d = b2.reshape(1, E)

    itemsize = jnp.dtype(x.dtype).itemsize
    # Double-buffered input/output blocks + f32 accumulator + hidden temp headroom.
    block_bytes = 2 * (tm * E + E * th + th + th * E + E + tm * E) * itemsize
    block_bytes += tm * E * 4        # f32 accumulator scratch
    block_bytes += 2 * tm * th * 4   # (tm, th) ReLU temp headroom
    vmem_limit = int(min(64 * 1024 * 1024, max(block_bytes, 16 * 1024 * 1024)))

    cost = pl.CostEstimate(
        flops=4 * M * E * H,                     # two matmuls: 2*M*E*H each
        transcendentals=0,
        bytes_accessed=(2 * M * E + 2 * E * H + H + E) * itemsize,
    )

    out = pl.pallas_call(
        _ffwd_kernel,
        out_shape=jax.ShapeDtypeStruct((Mp, E), x.dtype),
        grid_spec=pltpu.PrefetchScalarGridSpec(
            num_scalar_prefetch=0,
            grid=(Mp // tm, H // th),            # reduction axis (H) last
            in_specs=[
                pl.BlockSpec((tm, E), lambda i, j: (i, 0)),   # x tile
                pl.BlockSpec((E, th), lambda i, j: (0, j)),   # W1^T tile
                pl.BlockSpec((1, th), lambda i, j: (0, j)),   # b1 tile
                pl.BlockSpec((th, E), lambda i, j: (j, 0)),   # W2^T tile
                pl.BlockSpec((1, E), lambda i, j: (0, 0)),    # b2
            ],
            out_specs=pl.BlockSpec((tm, E), lambda i, j: (i, 0)),
            scratch_shapes=[pltpu.VMEM((tm, E), jnp.float32)],
        ),
        compiler_params=pltpu.CompilerParams(
            dimension_semantics=("parallel", "arbitrary"),
            vmem_limit_bytes=vmem_limit,
        ),
        cost_estimate=cost,
    )(x2d, w1_t, b1_2d, w2_t, b2_2d)

    return out[:M].reshape(B, T, E)


def init_params(key, n_embd, dtype=jnp.float32):
    """Deterministic synthetic init matching nn.Linear shapes.

    PyTorch: Linear(E, 4E).weight is (4E, E); we store the transpose (E, 4E)
    so the kernel computes x @ W^T directly.
    """
    hidden = 4 * n_embd
    k1, k2, k3, k4 = jax.random.split(key, 4)
    bound1 = 1.0 / jnp.sqrt(n_embd)
    bound2 = 1.0 / jnp.sqrt(hidden)
    w1_t = jax.random.uniform(k1, (n_embd, hidden), dtype, -bound1, bound1)
    b1 = jax.random.uniform(k2, (hidden,), dtype, -bound1, bound1)
    w2_t = jax.random.uniform(k3, (hidden, n_embd), dtype, -bound2, bound2)
    b2 = jax.random.uniform(k4, (n_embd,), dtype, -bound2, bound2)
    return w1_t, b1, w2_t, b2


if __name__ == "__main__":
    n_embd = 32      # E (toy; real configs should use E multiple of 128)
    batch, seq = 2, 8

    key = jax.random.PRNGKey(0)
    kx, kp = jax.random.split(key)
    x = jax.random.normal(kx, (batch, seq, n_embd), jnp.float32)
    w1_t, b1, w2_t, b2 = init_params(kp, n_embd)

    y = feed_forward(x, w1_t, b1, w2_t, b2)
    y = jax.block_until_ready(y)

    # Pure-JAX reference check of the fused kernel.
    ref = jnp.maximum(x @ w1_t + b1, 0.0) @ w2_t + b2
    assert y.shape == (batch, seq, n_embd)
    assert jnp.allclose(y, ref, atol=1e-5, rtol=1e-5)

    print("KERNEL_OK")
</pallas_src>

<mosaic_0001>
module attributes {stable_mosaic.version = 11 : i64} {
  func.func @_ffwd_kernel(%arg0: i32, %arg1: i32, %arg2: memref<128x32xf32, #tpu.memory_space<vmem>>, %arg3: memref<32x128xf32, #tpu.memory_space<vmem>>, %arg4: memref<1x128xf32, #tpu.memory_space<vmem>>, %arg5: memref<128x32xf32, #tpu.memory_space<vmem>>, %arg6: memref<1x32xf32, #tpu.memory_space<vmem>>, %arg7: memref<128x32xf32, #tpu.memory_space<vmem>>, %arg8: memref<128x32xf32, #tpu.memory_space<vmem>>) attributes {dimension_semantics = [#tpu.dimension_semantics<parallel>, #tpu.dimension_semantics<arbitrary>], iteration_bounds = array<i64: 1, 1>, scalar_prefetch = 0 : i64, scratch_operands = 1 : i64, tpu.core_type = #tpu.core_type<tc>, window_params = [{transform_indices = @transform_0, window_bounds = array<i64: 128, 32>}, {transform_indices = @transform_1, window_bounds = array<i64: 32, 128>}, {transform_indices = @transform_2, window_bounds = array<i64: 1, 128>}, {transform_indices = @transform_3, window_bounds = array<i64: 128, 32>}, {pipeline_mode = #tpu.pipeline_mode<synchronous>, transform_indices = @transform_4, window_bounds = array<i64: 1, 32>}, {transform_indices = @transform_5, window_bounds = array<i64: 128, 32>}]} {
    %c0_i32 = arith.constant 0 : i32
    %0 = arith.cmpi eq, %arg1, %c0_i32 : i32
    %1 = arith.extui %0 : i1 to i32
    %c0_i32_0 = arith.constant 0 : i32
    %2 = arith.cmpi ne, %1, %c0_i32_0 : i32
    scf.if %2 {
      %cst_16 = arith.constant 0.000000e+00 : f32
      %19 = vector.broadcast %cst_16 : f32 to vector<128x32xf32>
      %c0_17 = arith.constant 0 : index
      %c0_18 = arith.constant 0 : index
      %20 = vector.load %arg8[%c0_17, %c0_18] : memref<128x32xf32, #tpu.memory_space<vmem>>, vector<128x32xf32>
      tpu.vector_store %arg8[%c0_17, %c0_18], %19 {strides = array<i32>} : memref<128x32xf32, #tpu.memory_space<vmem>>, vector<128x32xf32>,
    } else {
    }
    %c0 = arith.constant 0 : index
    %c0_1 = arith.constant 0 : index
    %3 = vector.load %arg2[%c0, %c0_1] : memref<128x32xf32, #tpu.memory_space<vmem>>, vector<128x32xf32>
    %c0_2 = arith.constant 0 : index
    %c0_3 = arith.constant 0 : index
    %4 = vector.load %arg3[%c0_2, %c0_3] : memref<32x128xf32, #tpu.memory_space<vmem>>, vector<32x128xf32>
    %cst = arith.constant dense<0.000000e+00> : vector<128x128xf32>
    %5 = tpu.matmul %3, %4, %cst {dimension_numbers = #tpu.dot_dimension_numbers<[1], [0], [0], [1], [0, 0, 1, 1], [], []>} : vector<128x32xf32>, vector<32x128xf32>, vector<128x128xf32> -> vector<128x128xf32>
    %c0_4 = arith.constant 0 : index
    %c0_5 = arith.constant 0 : index
    %6 = vector.load %arg4[%c0_4, %c0_5] : memref<1x128xf32, #tpu.memory_space<vmem>>, vector<1x128xf32>
    %7 = vector.broadcast %6 : vector<1x128xf32> to vector<128x128xf32>
    %8 = arith.addf %5, %7 : vector<128x128xf32>
    %cst_6 = arith.constant 0.000000e+00 : f32
    %9 = vector.broadcast %cst_6 : f32 to vector<128x128xf32>
    %10 = arith.maximumf %8, %9 : vector<128x128xf32>
    %c0_7 = arith.constant 0 : index
    %c0_8 = arith.constant 0 : index
    %11 = vector.load %arg8[%c0_7, %c0_8] : memref<128x32xf32, #tpu.memory_space<vmem>>, vector<128x32xf32>
    %c0_9 = arith.constant 0 : index
    %c0_10 = arith.constant 0 : index
    %12 = vector.load %arg5[%c0_9, %c0_10] : memref<128x32xf32, #tpu.memory_space<vmem>>, vector<128x32xf32>
    %cst_11 = arith.constant dense<0.000000e+00> : vector<128x32xf32>
    %13 = tpu.matmul %10, %12, %cst_11 {dimension_numbers = #tpu.dot_dimension_numbers<[1], [0], [0], [1], [0, 0, 1, 1], [], []>} : vector<128x128xf32>, vector<128x32xf32>, vector<128x32xf32> -> vector<128x32xf32>
    %14 = arith.addf %11, %13 : vector<128x32xf32>
    %c0_12 = arith.constant 0 : index
    %c0_13 = arith.constant 0 : index
    %15 = vector.load %arg8[%c0_12, %c0_13] : memref<128x32xf32, #tpu.memory_space<vmem>>, vector<128x32xf32>
    tpu.vector_store %arg8[%c0_12, %c0_13], %14 {strides = array<i32>} : memref<128x32xf32, #tpu.memory_space<vmem>>, vector<128x32xf32>,
    %c0_i32_14 = arith.constant 0 : i32
    %16 = arith.cmpi eq, %arg1, %c0_i32_14 : i32
    %17 = arith.extui %16 : i1 to i32
    %c0_i32_15 = arith.constant 0 : i32
    %18 = arith.cmpi ne, %17, %c0_i32_15 : i32
    scf.if %18 {
      %c0_16 = arith.constant 0 : index
      %c0_17 = arith.constant 0 : index
      %19 = vector.load %arg8[%c0_16, %c0_17] : memref<128x32xf32, #tpu.memory_space<vmem>>, vector<128x32xf32>
      %c0_18 = arith.constant 0 : index
      %c0_19 = arith.constant 0 : index
      %20 = vector.load %arg6[%c0_18, %c0_19] : memref<1x32xf32, #tpu.memory_space<vmem>>, vector<1x32xf32>
      %21 = vector.broadcast %20 : vector<1x32xf32> to vector<128x32xf32>
      %22 = arith.addf %19, %21 : vector<128x32xf32>
      %c0_20 = arith.constant 0 : index
      %c0_21 = arith.constant 0 : index
      %23 = vector.load %arg7[%c0_20, %c0_21] : memref<128x32xf32, #tpu.memory_space<vmem>>, vector<128x32xf32>
      tpu.vector_store %arg7[%c0_20, %c0_21], %22 {strides = array<i32>} : memref<128x32xf32, #tpu.memory_space<vmem>>, vector<128x32xf32>,
    } else {
    }
    return
  }
  func.func @transform_0(%arg0: i32, %arg1: i32) -> (i32, i32) {
    %c0_i32 = arith.constant 0 : i32
    %c0_i32_0 = arith.constant 0 : i32
    return %arg0, %c0_i32 : i32, i32
  }
  func.func @transform_1(%arg0: i32, %arg1: i32) -> (i32, i32) {
    %c0_i32 = arith.constant 0 : i32
    %c0_i32_0 = arith.constant 0 : i32
    return %c0_i32, %arg1 : i32, i32
  }
  func.func @transform_2(%arg0: i32, %arg1: i32) -> (i32, i32) {
    %c0_i32 = arith.constant 0 : i32
    %c0_i32_0 = arith.constant 0 : i32
    return %c0_i32, %arg1 : i32, i32
  }
  func.func @transform_3(%arg0: i32, %arg1: i32) -> (i32, i32) {
    %c0_i32 = arith.constant 0 : i32
    %c0_i32_0 = arith.constant 0 : i32
    return %arg1, %c0_i32 : i32, i32
  }
  func.func @transform_4(%arg0: i32, %arg1: i32) -> (i32, i32) {
    %c0_i32 = arith.constant 0 : i32
    %c0_i32_0 = arith.constant 0 : i32
    %c0_i32_1 = arith.constant 0 : i32
    return %c0_i32, %c0_i32_0 : i32, i32
  }
  func.func @transform_5(%arg0: i32, %arg1: i32) -> (i32, i32) {
    %c0_i32 = arith.constant 0 : i32
    %c0_i32_0 = arith.constant 0 : i32
    return %arg0, %c0_i32 : i32, i32
  }
}

</mosaic_0001>

<bundles_post_ra>
// kernel: feed_forward.1
= control target key start
LH: loop header
LB: loop body
LE: loop exit
PB: predicated region body
PF: predicated region fallthrough
CT: control target
= control target key end

     0   :  { %vm24_vm0 = vcmask 261120   ;;  %v764_v46 = vmov 0.0   ;;  %s1039_s1 = inlined_call_operand.vmem [shape: f32[32,128], index: 1, kind: input, shape index: {}]   ;;  %s1040_s0 = inlined_call_operand.vmem [shape: f32[128,32], index: 0, kind: input, shape index: {}]   ;;  %s1041_s3 = inlined_call_operand.vmem [shape: f32[128,32], index: 3, kind: input, shape index: {}]   ;;  %s1042_s2 = inlined_call_operand.vmem [shape: f32[1,128], index: 2, kind: input, shape index: {}]   ;;  %s1043_s4 = inlined_call_operand.vmem [shape: f32[1,32], index: 4, kind: input, shape index: {}]   ;;  %s1044_s5 = inlined_call_operand.vmem [shape: f32[128,32], index: 5, kind: output, shape index: {}]  }
   0x1   :  { %v57_v0 = vld [vmem:[%s1039_s1] sm:$0xff]  ;;  %v58_v1 = vld [vmem:[%s1039_s1 + $0x8] sm:$0xff]  ;;  %v59_v2 = vld [vmem:[%s1039_s1 + $0x10] sm:$0xff]  ;;  %26 = vst.msk [vmem:[#allocation2 + $0x8] sm:$0xff] %vm24_vm0, %v764_v46 }
   0x2   :  { %v707_v3 = vpack.c.bf16 %v58_v1, %v57_v0  ;;  %v60_v4 = vld [vmem:[%s1039_s1 + $0x18] sm:$0xff]  ;;  %v41_v5 = vld [vmem:[%s1040_s0] sm:$0xff]  ;;  %v295_v8 = vld [vmem:[%s1041_s3 + $0x8] sm:$0xff]  ;;  %25 = vst.msk [vmem:[#allocation2] sm:$0xff] %vm24_vm0, %v764_v46 }
   0x3   :  { %v711_v6 = vpack.c.bf16 %v60_v4, %v59_v2  ;;  %627 = vmatprep.mubr.msk.f32.mxu0 %vm24_vm0, %v41_v5  ;;  %v294_v7 = vld [vmem:[%s1041_s3] sm:$0xff]  ;;  %v296_v9 = vld [vmem:[%s1041_s3 + $0x10] sm:$0xff]  ;;  %v297_v10 = vld [vmem:[%s1041_s3 + $0x18] sm:$0xff]  ;;  %27 = vst.msk [vmem:[#allocation2 + $0x10] sm:$0xff] %vm24_vm0, %v764_v46 }
   0x4   :  { %708 = vmatprep.subr.bf16.mxu0 %v707_v3  ;;  %v42_v11 = vld [vmem:[%s1040_s0 + $0x8] sm:$0xff]  ;;  %v715_v12 = vpack.c.bf16 %v295_v8, %v294_v7  ;;  %v43_v13 = vld [vmem:[%s1040_s0 + $0x10] sm:$0xff]  ;;  %v719_v14 = vpack.c.bf16 %v297_v10, %v296_v9  ;;  %v298_v15 = vld [vmem:[%s1041_s3 + $0x20] sm:$0xff]  ;;  %28 = vst.msk [vmem:[#allocation2 + $0x18] sm:$0xff] %vm24_vm0, %v764_v46 }
   0x5   :  { %710 = vmatpush3.bf16.msra.mxu0 %v707_v3  ;;  %v299_v16 = vld [vmem:[%s1041_s3 + $0x28] sm:$0xff]  ;;  %v44_v17 = vld [vmem:[%s1040_s0 + $0x18] sm:$0xff]  ;;  %v45_v18 = vld [vmem:[%s1040_s0 + $0x20] sm:$0xff]  ;;  %29 = vst.msk [vmem:[#allocation2 + $0x20] sm:$0xff] %vm24_vm0, %v764_v46 }
   0x6   :  { %712 = vmatprep.subr.bf16.mxu0 %v711_v6  ;;  %747 = vmatprep.subr.bf16.mxu1 %v715_v12  ;;  %v723_v19 = vpack.c.bf16 %v299_v16, %v298_v15  ;;  %v300_v20 = vld [vmem:[%s1041_s3 + $0x30] sm:$0xff]  ;;  %v301_v21 = vld [vmem:[%s1041_s3 + $0x38] sm:$0xff]  ;;  %v46_v22 = vld [vmem:[%s1040_s0 + $0x28] sm:$0xff]  ;;  %30 = vst.msk [vmem:[#allocation2 + $0x28] sm:$0xff] %vm24_vm0, %v764_v46 }
   0x7   :  { %755 = vmatpush3.bf16.msra.mxu1 %v715_v12  ;;  %v47_v23 = vld [vmem:[%s1040_s0 + $0x30] sm:$0xff]  ;;  %v727_v24 = vpack.c.bf16 %v301_v21, %v300_v20  ;;  %v302_v25 = vld [vmem:[%s1041_s3 + $0x40] sm:$0xff]  ;;  %v303_v26 = vld [vmem:[%s1041_s3 + $0x48] sm:$0xff]  ;;  %31 = vst.msk [vmem:[#allocation2 + $0x30] sm:$0xff] %vm24_vm0, %v764_v46 }
   0x8   :  { %748 = vmatprep.subr.bf16.mxu1 %v719_v14  ;;  %v48_v27 = vld [vmem:[%s1040_s0 + $0x38] sm:$0xff]  ;;  %v49_v28 = vld [vmem:[%s1040_s0 + $0x40] sm:$0xff]  ;;  %v731_v29 = vpack.c.bf16 %v303_v26, %v302_v25  ;;  %v304_v30 = vld [vmem:[%s1041_s3 + $0x50] sm:$0xff]  ;;  %32 = vst.msk [vmem:[#allocation2 + $0x38] sm:$0xff] %vm24_vm0, %v764_v46 }
   0x9   :  { %714 = vmatpush3.bf16.msra.mxu0 %v711_v6  ;;  %v305_v31 = vld [vmem:[%s1041_s3 + $0x58] sm:$0xff]  ;;  %v50_v32 = vld [vmem:[%s1040_s0 + $0x48] sm:$0xff]  ;;  %v51_v33 = vld [vmem:[%s1040_s0 + $0x50] sm:$0xff]  ;;  %33 = vst.msk [vmem:[#allocation2 + $0x40] sm:$0xff] %vm24_vm0, %v764_v46 }
   0xa   :  { %716 = vmatprep.subr.bf16.mxu0 %v715_v12  ;;  %v735_v34 = vpack.c.bf16 %v305_v31, %v304_v30  ;;  %v306_v35 = vld [vmem:[%s1041_s3 + $0x60] sm:$0xff]  ;;  %v307_v36 = vld [vmem:[%s1041_s3 + $0x68] sm:$0xff]  ;;  %v52_v37 = vld [vmem:[%s1040_s0 + $0x58] sm:$0xff]  ;;  %34 = vst.msk [vmem:[#allocation2 + $0x48] sm:$0xff] %vm24_vm0, %v764_v46 }
   0xb   :  { %756 = vmatpush3.bf16.msra.mxu1 %v719_v14  ;;  %v53_v38 = vld [vmem:[%s1040_s0 + $0x60] sm:$0xff]  ;;  %v739_v39 = vpack.c.bf16 %v307_v36, %v306_v35  ;;  %v54_v40 = vld [vmem:[%s1040_s0 + $0x68] sm:$0xff]  ;;  %v55_v41 = vld [vmem:[%s1040_s0 + $0x70] sm:$0xff]  ;;  %35 = vst.msk [vmem:[#allocation2 + $0x50] sm:$0xff] %vm24_vm0, %v764_v46 }
   0xc   :  { %628 = vmatmul.mubr.msk.f32.vlgmr.msra.gmra.mrb[0].mxu0 %vm24_vm0, %v42_v11  ;;  %749 = vmatprep.subr.bf16.mxu1 %v723_v19  ;;  %v56_v42 = vld [vmem:[%s1040_s0 + $0x78] sm:$0xff]  ;;  %v308_v43 = vld [vmem:[%s1041_s3 + $0x70] sm:$0xff]  ;;  %36 = vst.msk [vmem:[#allocation2 + $0x58] sm:$0xff] %vm24_vm0, %v764_v46  ;;  %37 = vst.msk [vmem:[#allocation2 + $0x60] sm:$0xff] %vm24_vm0, %v764_v46 }
   0xd   :  { %630 = vmatprep.mubr.msk.f32.mxu0 %vm24_vm0, %v43_v13  ;;  %718 = vmatpush3.bf16.msra.mxu0 %v715_v12  ;;  %v309_v44 = vld [vmem:[%s1041_s3 + $0x78] sm:$0xff]  ;;  %38 = vst.msk [vmem:[#allocation2 + $0x68] sm:$0xff] %vm24_vm0, %v764_v46  ;;  %39 = vst.msk [vmem:[#allocation2 + $0x70] sm:$0xff] %vm24_vm0, %v764_v46  ;;  %v549_v47 = vld [vmem:[%s1042_s2] ss:$0 sm:$0xff] }
   0xe   :  { %720 = vmatprep.subr.bf16.mxu0 %v719_v14  ;;  %v743_v45 = vpack.c.bf16 %v309_v44, %v308_v43  ;;  %40 = vst.msk [vmem:[#allocation2 + $0x78] sm:$0xff] %vm24_vm0, %v764_v46  ;;  %v283_v44 = vld [vmem:[#allocation2 + $0x28] sm:$0xff]  ;;  %v944_v46 = vld [vmem:[%s1043_s4] ss:$0 sm:$0xff] }
   0xf   :  { %757 = vmatpush3.bf16.msra.mxu1 %v723_v19 }
  0x10   :  { %631 = vmatmul.mubr.msk.f32.gmra.mrb[2].mxu0 %vm24_vm0, %v44_v17  ;;  %750 = vmatprep.subr.bf16.mxu1 %v727_v24 }
  0x11   :  { %633 = vmatprep.mubr.msk.f32.mxu0 %vm24_vm0, %v45_v18  ;;  %722 = vmatpush3.bf16.msra.mxu0 %v719_v14 }
  0x12   :  { %724 = vmatprep.subr.bf16.mxu0 %v723_v19 }
  0x13   :  { %758 = vmatpush3.bf16.msra.mxu1 %v727_v24 }
  0x14   :  { %634 = vmatmul.mubr.msk.f32.gmra.mrb[4].mxu0 %vm24_vm0, %v46_v22  ;;  %751 = vmatprep.subr.bf16.mxu1 %v731_v29 }
  0x15   :  { %636 = vmatprep.mubr.msk.f32.mxu0 %vm24_vm0, %v47_v23  ;;  %726 = vmatpush3.bf16.msra.mxu0 %v723_v19 }
  0x16   :  { %728 = vmatprep.subr.bf16.mxu0 %v727_v24 }
  0x17   :  { %759 = vmatpush3.bf16.msra.mxu1 %v731_v29 }
  0x18   :  { %637 = vmatmul.mubr.msk.f32.gmra.mrb[6].mxu0 %vm24_vm0, %v48_v27  ;;  %752 = vmatprep.subr.bf16.mxu1 %v735_v34 }
  0x19   :  { %639 = vmatprep.mubr.msk.f32.mxu0 %vm24_vm0, %v49_v28  ;;  %730 = vmatpush3.bf16.msra.mxu0 %v727_v24 }
  0x1a   :  { %732 = vmatprep.subr.bf16.mxu0 %v731_v29 }
  0x1b   :  { %760 = vmatpush3.bf16.msra.mxu1 %v735_v34 }
  0x1c   :  { %640 = vmatmul.mubr.msk.f32.gmra.mrb[8].mxu0 %vm24_vm0, %v50_v32  ;;  %753 = vmatprep.subr.bf16.mxu1 %v739_v39  ;;  %v279_v32 = vld [vmem:[#allocation2 + $0x8] sm:$0xff] }
  0x1d   :  { %642 = vmatprep.mubr.msk.f32.mxu0 %vm24_vm0, %v51_v33  ;;  %734 = vmatpush3.bf16.msra.mxu0 %v731_v29  ;;  %v278_v33 = vld [vmem:[#allocation2] sm:$0xff] }
  0x1e   :  { %736 = vmatprep.subr.bf16.mxu0 %v735_v34 }
  0x1f   :  { %761 = vmatpush3.bf16.msra.mxu1 %v739_v39 }
  0x20   :  { %643 = vmatmul.mubr.msk.f32.gmra.mrb[10].mxu0 %vm24_vm0, %v52_v37  ;;  %754 = vmatprep.subr.bf16.mxu1 %v743_v45 }
  0x21   :  { %645 = vmatprep.mubr.msk.f32.mxu0 %vm24_vm0, %v53_v38  ;;  %738 = vmatpush3.bf16.msra.mxu0 %v735_v34  ;;  %v281_v38 = vld [vmem:[#allocation2 + $0x18] sm:$0xff] }
  0x22   :  { %740 = vmatprep.subr.bf16.mxu0 %v739_v39 }
  0x23   :  { %762 = vmatpush3.bf16.msra.mxu1 %v743_v45 }
  0x24   :  { %646 = vmatmul.mubr.msk.f32.gmra.mrb[12].mxu0 %vm24_vm0, %v54_v40 }
  0x25   :  { %648 = vmatprep.mubr.msk.f32.mxu0 %vm24_vm0, %v55_v41  ;;  %742 = vmatpush3.bf16.msra.mxu0 %v739_v39  ;;  %v280_v39 = vld [vmem:[#allocation2 + $0x10] sm:$0xff] }
  0x26   :  { %744 = vmatprep.subr.bf16.mxu0 %v743_v45 }
  0x28   :  { %649 = vmatmul.mubr.msk.f32.gmra.mrb[14].mxu0 %vm24_vm0, %v56_v42 }
  0x29   :  { %746 = vmatpush3.bf16.msra.mxu0 %v743_v45  ;;  %v282_v45 = vld [vmem:[#allocation2 + $0x20] sm:$0xff] }
  0xdf   :  { %v629_v48 = vpop.f32.mrb[0].mxu0 }
  0xe0   :  { %v189_v49 = vadd.f32 %v629_v48, %v549_v47  ;;  %v183_v50 = vpop.f32.mrb[1].mxu0 }
  0xe1   :  { %v184_v51 = vadd.f32 %v549_v47, %v183_v50 }
  0xe2   :  { %v263_v54 = vmax.f32 %v189_v49, 0.0 }
  0xe3   :  { %v262_v52 = vmax.f32 %v184_v51, 0.0  ;;  %v632_v53 = vpop.f32.mrb[2].mxu0 }
  0xe4   :  { %v199_v55 = vadd.f32 %v632_v53, %v549_v47  ;;  %v193_v56 = vpop.f32.mrb[3].mxu0 }
  0xe5   :  { %v194_v57 = vadd.f32 %v549_v47, %v193_v56  ;;  %683 = vmatprep.mubr.f32.mxu0 %v262_v52  ;;  %v285_v52 = vld [vmem:[#allocation2 + $0x38] sm:$0xff] }
  0xe6   :  { %684 = vmatmul.mubr.f32.vlgmr.msra.gmra.mrb[16].mxu0 %v263_v54  ;;  %v265_v60 = vmax.f32 %v199_v55, 0.0  ;;  %v284_v55 = vld [vmem:[#allocation2 + $0x30] sm:$0xff] }
  0xe7   :  { %v264_v58 = vmax.f32 %v194_v57, 0.0  ;;  %v635_v59 = vpop.f32.mrb[4].mxu0 }
  0xe8   :  { %v209_v61 = vadd.f32 %v635_v59, %v549_v47  ;;  %v203_v62 = vpop.f32.mrb[5].mxu0 }
  0xe9   :  { %v204_v63 = vadd.f32 %v549_v47, %v203_v62  ;;  %686 = vmatprep.mubr.f32.mxu0 %v264_v58  ;;  %v287_v62 = vld [vmem:[#allocation2 + $0x48] sm:$0xff] }
  0xea   :  { %687 = vmatmul.mubr.f32.gmra.mrb[18].mxu0 %v265_v60  ;;  %v267_v2 = vmax.f32 %v209_v61, 0.0 }
  0xeb   :  { %v266_v0 = vmax.f32 %v204_v63, 0.0  ;;  %v638_v1 = vpop.f32.mrb[6].mxu0 }
  0xec   :  { %v219_v3 = vadd.f32 %v638_v1, %v549_v47  ;;  %v213_v4 = vpop.f32.mrb[7].mxu0  ;;  %v286_v1 = vld [vmem:[#allocation2 + $0x40] sm:$0xff] }
  0xed   :  { %689 = vmatprep.mubr.f32.mxu0 %v266_v0  ;;  %v214_v5 = vadd.f32 %v549_v47, %v213_v4 }
  0xee   :  { %690 = vmatmul.mubr.f32.gmra.mrb[20].mxu0 %v267_v2  ;;  %v269_v8 = vmax.f32 %v219_v3, 0.0 }
  0xef   :  { %v641_v6 = vpop.f32.mrb[8].mxu0  ;;  %v268_v7 = vmax.f32 %v214_v5, 0.0 }
  0xf0   :  { %v229_v9 = vadd.f32 %v641_v6, %v549_v47  ;;  %v223_v10 = vpop.f32.mrb[9].mxu0 }
  0xf1   :  { %v224_v11 = vadd.f32 %v549_v47, %v223_v10  ;;  %692 = vmatprep.mubr.f32.mxu1 %v268_v7 }
  0xf2   :  { %693 = vmatmul.mubr.f32.vlgmr.msra.gmra.mrb[0].mxu1 %v269_v8  ;;  %v271_v14 = vmax.f32 %v229_v9, 0.0  ;;  %v289_v8 = vld [vmem:[#allocation2 + $0x58] sm:$0xff] }
  0xf3   :  { %v270_v12 = vmax.f32 %v224_v11, 0.0  ;;  %v644_v13 = vpop.f32.mrb[10].mxu0  ;;  %v288_v11 = vld [vmem:[#allocation2 + $0x50] sm:$0xff] }
  0xf4   :  { %v239_v15 = vadd.f32 %v644_v13, %v549_v47  ;;  %v233_v16 = vpop.f32.mrb[11].mxu0 }
  0xf5   :  { %v234_v17 = vadd.f32 %v549_v47, %v233_v16  ;;  %695 = vmatprep.mubr.f32.mxu1 %v270_v12 }
  0xf6   :  { %696 = vmatmul.mubr.f32.gmra.mrb[2].mxu1 %v271_v14  ;;  %v273_v20 = vmax.f32 %v239_v15, 0.0 }
  0xf7   :  { %v272_v18 = vmax.f32 %v234_v17, 0.0  ;;  %v647_v19 = vpop.f32.mrb[12].mxu0 }
  0xf8   :  { %v249_v21 = vadd.f32 %v647_v19, %v549_v47  ;;  %v243_v22 = vpop.f32.mrb[13].mxu0 }
  0xf9   :  { %v244_v23 = vadd.f32 %v549_v47, %v243_v22  ;;  %698 = vmatprep.mubr.f32.mxu1 %v272_v18  ;;  %v291_v18 = vld [vmem:[#allocation2 + $0x68] sm:$0xff] }
  0xfa   :  { %699 = vmatmul.mubr.f32.gmra.mrb[4].mxu1 %v273_v20  ;;  %v275_v26 = vmax.f32 %v249_v21, 0.0  ;;  %v290_v21 = vld [vmem:[#allocation2 + $0x60] sm:$0xff] }
  0xfb   :  { %v274_v24 = vmax.f32 %v244_v23, 0.0  ;;  %v650_v25 = vpop.f32.mrb[14].mxu0 }
  0xfc   :  { %v259_v27 = vadd.f32 %v650_v25, %v549_v47  ;;  %v253_v28 = vpop.f32.mrb[15].mxu0 }
  0xfd   :  { %v254_v29 = vadd.f32 %v549_v47, %v253_v28  ;;  %701 = vmatprep.mubr.f32.mxu1 %v274_v24  ;;  %v293_v28 = vld [vmem:[#allocation2 + $0x78] sm:$0xff] }
  0xfe   :  { %702 = vmatmul.mubr.f32.gmra.mrb[6].mxu1 %v275_v26  ;;  %v277_v31 = vmax.f32 %v259_v27, 0.0 }
  0xff   :  { %v276_v30 = vmax.f32 %v254_v29, 0.0 }
 0x101   :  { %704 = vmatprep.mubr.f32.mxu1 %v276_v30 }
 0x102   :  { %705 = vmatmul.mubr.f32.gmra.mrb[8].mxu1 %v277_v31  ;;  %v292_v31 = vld [vmem:[#allocation2 + $0x70] sm:$0xff] }
 0x1b9   :  { %v685_v34 = vpop.f32.mrb[16].mxu0 }
 0x1ba   :  { %v456_v35 = vadd.f32 %v685_v34, %v279_v32  ;;  %v376_v36 = vpop.f32.mrb[17].mxu0 }
 0x1bb   :  { %v455_v37 = vadd.f32 %v376_v36, %v278_v33 }
 0x1bc   :  { %472 = vst.msk [vmem:[#allocation2 + $0x8] sm:$0xff] %vm24_vm0, %v456_v35 }
 0x1bd   :  { %471 = vst.msk [vmem:[#allocation2] sm:$0xff] %vm24_vm0, %v455_v37  ;;  %v688_v40 = vpop.f32.mrb[18].mxu0 }
 0x1be   :  { %v458_v41 = vadd.f32 %v688_v40, %v281_v38  ;;  %v386_v42 = vpop.f32.mrb[19].mxu0 }
 0x1bf   :  { %v457_v43 = vadd.f32 %v386_v42, %v280_v39 }
 0x1c0   :  { %474 = vst.msk [vmem:[#allocation2 + $0x18] sm:$0xff] %vm24_vm0, %v458_v41 }
 0x1c1   :  { %473 = vst.msk [vmem:[#allocation2 + $0x10] sm:$0xff] %vm24_vm0, %v457_v43  ;;  %v691_v47 = vpop.f32.mrb[20].mxu0 }
 0x1c2   :  { %v460_v48 = vadd.f32 %v691_v47, %v283_v44  ;;  %v396_v49 = vpop.f32.mrb[21].mxu0 }
 0x1c3   :  { %v491_v50 = vld [vmem:[#allocation2 + $0x8] sm:$0xff]  ;;  %v459_v51 = vadd.f32 %v396_v49, %v282_v45 }
 0x1c4   :  { %v514_v53 = vadd.f32 %v944_v46, %v491_v50  ;;  %v490_v54 = vld [vmem:[#allocation2] sm:$0xff]  ;;  %476 = vst.msk [vmem:[#allocation2 + $0x28] sm:$0xff] %vm24_vm0, %v460_v48 }
 0x1c5   :  { %v513_v56 = vadd.f32 %v944_v46, %v490_v54  ;;  %475 = vst.msk [vmem:[#allocation2 + $0x20] sm:$0xff] %vm24_vm0, %v459_v51  ;;  %v694_v57 = vpop.f32.mrb[0].mxu1 }
 0x1c6   :  { %530 = vst.msk [vmem:[%s1044_s5 + $0x8] sm:$0xff] %vm24_vm0, %v514_v53  ;;  %v462_v58 = vadd.f32 %v694_v57, %v285_v52  ;;  %v406_v59 = vpop.f32.mrb[1].mxu1 }
 0x1c7   :  { %529 = vst.msk [vmem:[%s1044_s5] sm:$0xff] %vm24_vm0, %v513_v56  ;;  %v493_v60 = vld [vmem:[#allocation2 + $0x18] sm:$0xff]  ;;  %v461_v61 = vadd.f32 %v406_v59, %v284_v55 }
 0x1c8   :  { %v516_v63 = vadd.f32 %v944_v46, %v493_v60  ;;  %v492_v0 = vld [vmem:[#allocation2 + $0x10] sm:$0xff]  ;;  %478 = vst.msk [vmem:[#allocation2 + $0x38] sm:$0xff] %vm24_vm0, %v462_v58 }
 0x1c9   :  { %v515_v2 = vadd.f32 %v944_v46, %v492_v0  ;;  %477 = vst.msk [vmem:[#allocation2 + $0x30] sm:$0xff] %vm24_vm0, %v461_v61  ;;  %v697_v3 = vpop.f32.mrb[2].mxu1 }
 0x1ca   :  { %532 = vst.msk [vmem:[%s1044_s5 + $0x18] sm:$0xff] %vm24_vm0, %v516_v63  ;;  %v464_v4 = vadd.f32 %v697_v3, %v287_v62  ;;  %v416_v5 = vpop.f32.mrb[3].mxu1 }
 0x1cb   :  { %531 = vst.msk [vmem:[%s1044_s5 + $0x10] sm:$0xff] %vm24_vm0, %v515_v2  ;;  %v495_v6 = vld [vmem:[#allocation2 + $0x28] sm:$0xff]  ;;  %v463_v7 = vadd.f32 %v416_v5, %v286_v1 }
 0x1cc   :  { %v518_v9 = vadd.f32 %v944_v46, %v495_v6  ;;  %v494_v10 = vld [vmem:[#allocation2 + $0x20] sm:$0xff]  ;;  %480 = vst.msk [vmem:[#allocation2 + $0x48] sm:$0xff] %vm24_vm0, %v464_v4 }
 0x1cd   :  { %v517_v12 = vadd.f32 %v944_v46, %v494_v10  ;;  %479 = vst.msk [vmem:[#allocation2 + $0x40] sm:$0xff] %vm24_vm0, %v463_v7  ;;  %v700_v13 = vpop.f32.mrb[4].mxu1 }
 0x1ce   :  { %534 = vst.msk [vmem:[%s1044_s5 + $0x28] sm:$0xff] %vm24_vm0, %v518_v9  ;;  %v466_v14 = vadd.f32 %v700_v13, %v289_v8  ;;  %v426_v15 = vpop.f32.mrb[5].mxu1 }
 0x1cf   :  { %533 = vst.msk [vmem:[%s1044_s5 + $0x20] sm:$0xff] %vm24_vm0, %v517_v12  ;;  %v497_v16 = vld [vmem:[#allocation2 + $0x38] sm:$0xff]  ;;  %v465_v17 = vadd.f32 %v426_v15, %v288_v11 }
 0x1d0   :  { %v520_v19 = vadd.f32 %v944_v46, %v497_v16  ;;  %v496_v20 = vld [vmem:[#allocation2 + $0x30] sm:$0xff]  ;;  %482 = vst.msk [vmem:[#allocation2 + $0x58] sm:$0xff] %vm24_vm0, %v466_v14 }
 0x1d1   :  { %v519_v22 = vadd.f32 %v944_v46, %v496_v20  ;;  %481 = vst.msk [vmem:[#allocation2 + $0x50] sm:$0xff] %vm24_vm0, %v465_v17  ;;  %v703_v23 = vpop.f32.mrb[6].mxu1 }
 0x1d2   :  { %536 = vst.msk [vmem:[%s1044_s5 + $0x38] sm:$0xff] %vm24_vm0, %v520_v19  ;;  %v468_v24 = vadd.f32 %v703_v23, %v291_v18  ;;  %v436_v25 = vpop.f32.mrb[7].mxu1 }
 0x1d3   :  { %535 = vst.msk [vmem:[%s1044_s5 + $0x30] sm:$0xff] %vm24_vm0, %v519_v22  ;;  %v499_v26 = vld [vmem:[#allocation2 + $0x48] sm:$0xff]  ;;  %v467_v27 = vadd.f32 %v436_v25, %v290_v21 }
 0x1d4   :  { %v522_v29 = vadd.f32 %v944_v46, %v499_v26  ;;  %v498_v30 = vld [vmem:[#allocation2 + $0x40] sm:$0xff]  ;;  %484 = vst.msk [vmem:[#allocation2 + $0x68] sm:$0xff] %vm24_vm0, %v468_v24 }
 0x1d5   :  { %v521_v32 = vadd.f32 %v944_v46, %v498_v30  ;;  %483 = vst.msk [vmem:[#allocation2 + $0x60] sm:$0xff] %vm24_vm0, %v467_v27  ;;  %v706_v33 = vpop.f32.mrb[8].mxu1 }
 0x1d6   :  { %538 = vst.msk [vmem:[%s1044_s5 + $0x48] sm:$0xff] %vm24_vm0, %v522_v29  ;;  %v470_v34 = vadd.f32 %v706_v33, %v293_v28  ;;  %v446_v35 = vpop.f32.mrb[9].mxu1 }
 0x1d7   :  { %537 = vst.msk [vmem:[%s1044_s5 + $0x40] sm:$0xff] %vm24_vm0, %v521_v32  ;;  %v501_v36 = vld [vmem:[#allocation2 + $0x58] sm:$0xff]  ;;  %v469_v37 = vadd.f32 %v446_v35, %v292_v31 }
 0x1d8   :  { %v524_v38 = vadd.f32 %v944_v46, %v501_v36  ;;  %v500_v39 = vld [vmem:[#allocation2 + $0x50] sm:$0xff]  ;;  %486 = vst.msk [vmem:[#allocation2 + $0x78] sm:$0xff] %vm24_vm0, %v470_v34 }
 0x1d9   :  { %v523_v40 = vadd.f32 %v944_v46, %v500_v39  ;;  %485 = vst.msk [vmem:[#allocation2 + $0x70] sm:$0xff] %vm24_vm0, %v469_v37 }
 0x1da   :  { %540 = vst.msk [vmem:[%s1044_s5 + $0x58] sm:$0xff] %vm24_vm0, %v524_v38 }
 0x1db   :  { %539 = vst.msk [vmem:[%s1044_s5 + $0x50] sm:$0xff] %vm24_vm0, %v523_v40  ;;  %v503_v41 = vld [vmem:[#allocation2 + $0x68] sm:$0xff] }
 0x1dc   :  { %v526_v42 = vadd.f32 %v944_v46, %v503_v41  ;;  %v502_v43 = vld [vmem:[#allocation2 + $0x60] sm:$0xff] }
 0x1dd   :  { %v525_v44 = vadd.f32 %v944_v46, %v502_v43 }
 0x1de   :  { %542 = vst.msk [vmem:[%s1044_s5 + $0x68] sm:$0xff] %vm24_vm0, %v526_v42 }
 0x1df   :  { %541 = vst.msk [vmem:[%s1044_s5 + $0x60] sm:$0xff] %vm24_vm0, %v525_v44  ;;  %v505_v45 = vld [vmem:[#allocation2 + $0x78] sm:$0xff] }
 0x1e0   :  { %v528_v47 = vadd.f32 %v944_v46, %v505_v45  ;;  %v504_v48 = vld [vmem:[#allocation2 + $0x70] sm:$0xff] }
 0x1e1   :  { %v527_v49 = vadd.f32 %v944_v46, %v504_v48 }
 0x1e2   :  { %544 = vst.msk [vmem:[%s1044_s5 + $0x78] sm:$0xff] %vm24_vm0, %v528_v47 }
 0x1e3   :  { %543 = vst.msk [vmem:[%s1044_s5 + $0x70] sm:$0xff] %vm24_vm0, %v527_v49 }

</bundles_post_ra>
